<compile_context>
chip_gen: v6e
topology: v6e:2x2x1
jax: 0.10.0
libtpu: 0.0.40
codegen_flags: <defaults>
</compile_context>

<pallas_src>
import functools

import jax
import jax.numpy as jnp
from jax.experimental import pallas as pl
from jax.experimental.pallas import tpu as pltpu


_VMEM_BUDGET = 24 << 20   # conservative double-buffered working-set budget (v7x-safe)
_VMEM_LIMIT = 32 << 20    # scoped-VMEM limit: >= v5e default, <= v6e/v7x defaults


def _round_up(x, m):
    return ((x + m - 1) // m) * m


def _pick_tile(total, preferred, min_steps=1):
    # Prefer a tile that yields at least `min_steps` grid steps (v7x: 2 TCs).
    for c in preferred:
        if c <= total and total % c == 0 and total // c >= min_steps:
            return c
    for c in preferred:
        if c <= total and total % c == 0:
            return c
    return total


# ---------------------------------------------------------------------------
# Kernel 1: wide feature projection   HWcat = H @ W2,   W2 = concat_r W[r]
#   H  : (Npad, Dpad)      W2 : (Dpad, R*Dpad)     HWcat : (Npad, R*Dpad)
# W2 is held resident (constant block index); H is streamed once per layer.
# ---------------------------------------------------------------------------
def _project_kernel(h_ref, w_ref, o_ref):
    o_ref[...] = jnp.dot(h_ref[...], w_ref[...],
                         preferred_element_type=jnp.float32).astype(o_ref.dtype)


def project_features(H, W2, *, tm, out_dtype):
    Npad, Dpad = H.shape
    RD = W2.shape[1]
    flops = 2.0 * Npad * Dpad * RD
    bytes_accessed = (H.size * H.dtype.itemsize + W2.size * W2.dtype.itemsize
                      + Npad * RD * jnp.dtype(out_dtype).itemsize)
    return pl.pallas_call(
        _project_kernel,
        out_shape=jax.ShapeDtypeStruct((Npad, RD), out_dtype),
        grid_spec=pltpu.PrefetchScalarGridSpec(
            num_scalar_prefetch=0,
            grid=(Npad // tm,),
            in_specs=[
                pl.BlockSpec((tm, Dpad), lambda i: (i, 0)),   # H tile (streamed)
                pl.BlockSpec((Dpad, RD), lambda i: (0, 0)),   # W2 (resident)
            ],
            out_specs=pl.BlockSpec((tm, RD), lambda i: (i, 0)),
        ),
        compiler_params=pltpu.CompilerParams(
            dimension_semantics=("parallel",),
            vmem_limit_bytes=_VMEM_LIMIT),
        cost_estimate=pl.CostEstimate(flops=int(flops), transcendentals=0,
                                      bytes_accessed=int(bytes_accessed)),
    )(H, W2)


# ---------------------------------------------------------------------------
# Kernel 2: relation-folded aggregation   O = act( A2 @ HW2 )
# Variant A (small/medium graphs): HW2 fully resident, single parallel dst axis,
# ReLU fused, no accumulator RMW.
# Variant B (large graphs): K-tiled reduction with direct store at k==0.
# ---------------------------------------------------------------------------
def _aggregate_full_kernel(a_ref, hw_ref, o_ref, *, apply_relu):
    acc = jnp.dot(a_ref[...], hw_ref[...], preferred_element_type=jnp.float32)
    if apply_relu:
        acc = jnp.maximum(acc, 0.0)
    o_ref[...] = acc


def _aggregate_ktiled_kernel(a_ref, hw_ref, o_ref, *, apply_relu):
    k = pl.program_id(1)
    partial = jnp.dot(a_ref[...], hw_ref[...], preferred_element_type=jnp.float32)

    @pl.when(k == 0)
    def _first():
        o_ref[...] = partial          # direct store: no zero-init + add pass

    @pl.when(k != 0)
    def _rest():
        o_ref[...] += partial

    if apply_relu:
        @pl.when(k == pl.num_programs(1) - 1)
        def _finalize():
            o_ref[...] = jnp.maximum(o_ref[...], 0.0)


def rgcn_aggregate(A2, HW2, *, apply_relu, tm):
    Npad, K = A2.shape
    Dpad = HW2.shape[1]
    in_bytes = A2.dtype.itemsize
    flops = 2.0 * Npad * K * Dpad
    bytes_accessed = (A2.size * in_bytes + HW2.size * HW2.dtype.itemsize
                      + Npad * Dpad * 4)
    cost = pl.CostEstimate(flops=int(flops), transcendentals=0,
                           bytes_accessed=int(bytes_accessed))

    # Variant A: HW2 resident in VMEM, no K reduction axis.
    full_ws = 2 * (tm * K + K * Dpad) * in_bytes + 2 * tm * Dpad * 4
    if full_ws <= _VMEM_BUDGET:
        kernel = functools.partial(_aggregate_full_kernel, apply_relu=apply_relu)
        return pl.pallas_call(
            kernel,
            out_shape=jax.ShapeDtypeStruct((Npad, Dpad), jnp.float32),
            grid_spec=pltpu.PrefetchScalarGridSpec(
                num_scalar_prefetch=0,
                grid=(Npad // tm,),
                in_specs=[
                    pl.BlockSpec((tm, K), lambda i: (i, 0)),    # A2 dst tile
                    pl.BlockSpec((K, Dpad), lambda i: (0, 0)),  # HW2 resident
                ],
                out_specs=pl.BlockSpec((tm, Dpad), lambda i: (i, 0)),
            ),
            compiler_params=pltpu.CompilerParams(
                dimension_semantics=("parallel",),
                vmem_limit_bytes=_VMEM_LIMIT),
            cost_estimate=cost,
        )(A2, HW2)

    # Variant B: K-tiled reduction (trailing "arbitrary" axis).
    tk = 128
    for cand in (4096, 2048, 1024, 512, 256, 128):
        ws = 2 * (tm * cand + cand * Dpad) * in_bytes + tm * Dpad * 4
        if cand <= K and K % cand == 0 and ws <= _VMEM_BUDGET:
            tk = cand
            break
    kernel = functools.partial(_aggregate_ktiled_kernel, apply_relu=apply_relu)
    return pl.pallas_call(
        kernel,
        out_shape=jax.ShapeDtypeStruct((Npad, Dpad), jnp.float32),
        grid_spec=pltpu.PrefetchScalarGridSpec(
            num_scalar_prefetch=0,
            grid=(Npad // tm, K // tk),
            in_specs=[
                pl.BlockSpec((tm, tk), lambda i, k: (i, k)),    # A2 tile
                pl.BlockSpec((tk, Dpad), lambda i, k: (k, 0)),  # HW2 tile
            ],
            out_specs=pl.BlockSpec((tm, Dpad), lambda i, k: (i, 0)),
        ),
        compiler_params=pltpu.CompilerParams(
            dimension_semantics=("parallel", "arbitrary"),
            vmem_limit_bytes=_VMEM_LIMIT),
        cost_estimate=cost,
    )(A2, HW2)


# ---------------------------------------------------------------------------
# Model: stack of R-GCN layers (matches Model.__init__ / Model.forward)
# ---------------------------------------------------------------------------
def model_forward(src, dst, rel, norm, rel_num, node_num, weights,
                  compute_dtype=jnp.float32):
    """Edge lists (src, dst, rel, norm); weights: list of (R, din, dout)."""
    R = rel_num
    N = node_num
    n_layers = len(weights)
    Npad = _round_up(N, 128)
    feat_dims = [w.shape[2] for w in weights] + [w.shape[1] for w in weights[1:]]
    Dpad = _round_up(max(feat_dims), 128)
    K = Npad * R

    # dst-tile size: prefer >= 2 grid steps so both v7x TensorCores get work.
    tm = _pick_tile(Npad, (512, 256, 128), min_steps=2)

    # Folded adjacency built DIRECTLY in its (dst, src*R + rel) layout with one
    # scatter: no dense (R, N, N) intermediate, no transpose/reshape copy.
    A2 = jnp.zeros((Npad, K), jnp.float32).at[dst, src * R + rel].add(norm)
    A2 = A2.astype(compute_dtype)

    # Input layer: H == eye(N) folds away; HW2 row s*R + r is W0[r][s, :].
    W0 = weights[0]
    HW0 = jnp.zeros((Npad, R, Dpad), jnp.float32)
    HW0 = HW0.at[:W0.shape[1], :, :W0.shape[2]].set(jnp.transpose(W0, (1, 0, 2)))
    HW2 = HW0.reshape(K, Dpad).astype(compute_dtype)
    H = rgcn_aggregate(A2, HW2, apply_relu=(n_layers > 1), tm=tm)

    # Hidden layers + output layer.
    for i in range(1, n_layers):
        W = weights[i]
        din, dout = W.shape[1], W.shape[2]
        # Wide weight: W2[:, r*Dpad + j] = W[r][:, j]   (tiny, built in glue JAX)
        W2 = jnp.zeros((Dpad, R, Dpad), jnp.float32)
        W2 = W2.at[:din, :, :dout].set(jnp.transpose(W, (1, 0, 2)))
        W2 = W2.reshape(Dpad, R * Dpad).astype(compute_dtype)

        HWcat = project_features(H.astype(compute_dtype), W2, tm=tm,
                                 out_dtype=compute_dtype)
        HW2 = HWcat.reshape(K, Dpad)            # contiguous: row s*R+r = (H@W[r])[s]
        H = rgcn_aggregate(A2, HW2, apply_relu=(i < n_layers - 1), tm=tm)

    return H[:N, :weights[-1].shape[2]]


# ---------------------------------------------------------------------------
# Deterministic parameter init (xavier_uniform_ on (rel, in, out) tensors)
# ---------------------------------------------------------------------------
def xavier_uniform(key, shape):
    rel, fin, fout = shape
    receptive = fout                 # PyTorch treats dims[2:] as receptive field
    fan_in = fin * receptive
    fan_out = rel * receptive
    bound = (6.0 / (fan_in + fan_out)) ** 0.5
    return jax.random.uniform(key, shape, jnp.float32, -bound, bound)


# ---------------------------------------------------------------------------
# Pure-JAX reference for correctness check
# ---------------------------------------------------------------------------
def reference_forward(A, weights):
    N = A.shape[1]
    H = jnp.eye(N, dtype=jnp.float32)
    n_layers = len(weights)
    for i, W in enumerate(weights):
        out = jnp.einsum("rds,sf,rfo->do", A, H, W, precision="highest")
        if i < n_layers - 1:
            out = jnp.maximum(out, 0.0)
        H = out
    return H


if __name__ == "__main__":
    key = jax.random.PRNGKey(0)

    # Small shapes consistent with Model(hidden_layer_num, rel_num, node_num)
    hidden_layer_num = 1
    rel_num = 3
    node_num = 8
    dim = 16          # Model.dim
    predict_num = 4   # Model.predict_num
    num_edges = 24

    # --- build a deterministic random graph (src, dst, rel, norm) ------------
    k_src, k_dst, k_rel, k_w0, k_wh, k_wo = jax.random.split(key, 6)
    src = jax.random.randint(k_src, (num_edges,), 0, node_num)
    dst = jax.random.randint(k_dst, (num_edges,), 0, node_num)
    rel = jax.random.randint(k_rel, (num_edges,), 0, rel_num)

    # norm = 1 / (#incoming edges of the same relation at dst), as in DGL R-GCN
    deg = jnp.zeros((rel_num, node_num), jnp.float32).at[rel, dst].add(1.0)
    norm = 1.0 / deg[rel, dst]

    # Dense per-relation adjacency (reference only): A[r, dst, src] = sum of norms
    A = jnp.zeros((rel_num, node_num, node_num), jnp.float32).at[rel, dst, src].add(norm)

    # --- parameters: input layer, hidden layers, output layer ----------------
    weights = [xavier_uniform(k_w0, (rel_num, node_num, dim))]
    hk = jax.random.split(k_wh, max(hidden_layer_num, 1))
    for i in range(hidden_layer_num):
        weights.append(xavier_uniform(hk[i], (rel_num, dim, dim)))
    weights.append(xavier_uniform(k_wo, (rel_num, dim, predict_num)))

    ref = reference_forward(A, weights)

    # --- f32 path: strict correctness check -----------------------------------
    out = model_forward(src, dst, rel, norm, rel_num, node_num, weights,
                        compute_dtype=jnp.float32)
    out = jax.block_until_ready(out)
    assert out.shape == (node_num, predict_num)
    assert jnp.allclose(out, ref, atol=1e-4, rtol=1e-4), "f32 mismatch vs reference"

    # --- bf16 inputs / f32 accumulation path (halves A2 HBM traffic, ~2x MXU) -
    out_bf16 = model_forward(src, dst, rel, norm, rel_num, node_num, weights,
                             compute_dtype=jnp.bfloat16)
    out_bf16 = jax.block_until_ready(out_bf16)
    assert out_bf16.shape == (node_num, predict_num)
    assert jnp.allclose(out_bf16, ref, atol=5e-2, rtol=5e-2), "bf16 mismatch vs reference"

    print("KERNEL_OK")
</pallas_src>

<mosaic_0001>
module attributes {stable_mosaic.version = 11 : i64} {
  func.func @_aggregate_full_kernel(%arg0: i32, %arg1: memref<128x384xf32, #tpu.memory_space<vmem>>, %arg2: memref<384x128xf32, #tpu.memory_space<vmem>>, %arg3: memref<128x128xf32, #tpu.memory_space<vmem>>) attributes {dimension_semantics = [#tpu.dimension_semantics<parallel>], iteration_bounds = array<i64: 1>, scalar_prefetch = 0 : i64, scratch_operands = 0 : i64, tpu.core_type = #tpu.core_type<tc>, window_params = [{transform_indices = @transform_0, window_bounds = array<i64: 128, 384>}, {pipeline_mode = #tpu.pipeline_mode<synchronous>, transform_indices = @transform_1, window_bounds = array<i64: 384, 128>}, {transform_indices = @transform_2, window_bounds = array<i64: 128, 128>}]} {
    %c0 = arith.constant 0 : index
    %c0_0 = arith.constant 0 : index
    %0 = vector.load %arg1[%c0, %c0_0] : memref<128x384xf32, #tpu.memory_space<vmem>>, vector<128x384xf32>
    %c0_1 = arith.constant 0 : index
    %c0_2 = arith.constant 0 : index
    %1 = vector.load %arg2[%c0_1, %c0_2] : memref<384x128xf32, #tpu.memory_space<vmem>>, vector<384x128xf32>
    %cst = arith.constant dense<0.000000e+00> : vector<128x128xf32>
    %2 = tpu.matmul %0, %1, %cst {dimension_numbers = #tpu.dot_dimension_numbers<[1], [0], [0], [1], [0, 0, 1, 1], [], []>} : vector<128x384xf32>, vector<384x128xf32>, vector<128x128xf32> -> vector<128x128xf32>
    %cst_3 = arith.constant 0.000000e+00 : f32
    %3 = vector.broadcast %cst_3 : f32 to vector<128x128xf32>
    %4 = arith.maximumf %2, %3 : vector<128x128xf32>
    %c0_4 = arith.constant 0 : index
    %c0_5 = arith.constant 0 : index
    %5 = vector.load %arg3[%c0_4, %c0_5] : memref<128x128xf32, #tpu.memory_space<vmem>>, vector<128x128xf32>
    tpu.vector_store %arg3[%c0_4, %c0_5], %4 {strides = array<i32>} : memref<128x128xf32, #tpu.memory_space<vmem>>, vector<128x128xf32>,
    return
  }
  func.func @transform_0(%arg0: i32) -> (i32, i32) {
    %c0_i32 = arith.constant 0 : i32
    %c0_i32_0 = arith.constant 0 : i32
    return %arg0, %c0_i32 : i32, i32
  }
  func.func @transform_1(%arg0: i32) -> (i32, i32) {
    %c0_i32 = arith.constant 0 : i32
    %c0_i32_0 = arith.constant 0 : i32
    %c0_i32_1 = arith.constant 0 : i32
    return %c0_i32, %c0_i32_0 : i32, i32
  }
  func.func @transform_2(%arg0: i32) -> (i32, i32) {
    %c0_i32 = arith.constant 0 : i32
    %c0_i32_0 = arith.constant 0 : i32
    return %arg0, %c0_i32 : i32, i32
  }
}

</mosaic_0001>

<bundles_post_ra>
// kernel: tpu_custom_call.1
= control target key start
LH: loop header
LB: loop body
LE: loop exit
PB: predicated region body
PF: predicated region fallthrough
CT: control target
= control target key end

     0   :  { %7 = vsyncpa [#allocation3], 0  ;;  %s754_s0 = inlined_call_operand.hbm [shape: f32[128,384], index: 0, kind: input, shape index: {}]   ;;  %s755_s1 = inlined_call_operand.hbm [shape: f32[384,128], index: 1, kind: input, shape index: {}]   ;;  %s756_s2 = inlined_call_operand.hbm [shape: f32[128,128], index: 2, kind: output, shape index: {}]  }
   0x1   :  { %8 = vsyncpa [#allocation6], 0 }
   0x2   :  { %9 = vsyncpa [#allocation4], 0  ;;  %s717_s9 = smov [#allocation2]  }
   0x3   :  { %s15_s10 = sshll.u32 %s717_s9, 4  ;;  %s16_s10 = int_to_ptr.vmem [resolvable:$true] %s15_s10 }
   0x4   :  { %s659_s11 = scalar_lea.vmem %s16_s10, 6144  ;;  %p664_p1 = scmp.lt.s32.totalorder %s16_s10, %s16_s10 }
   0x5   :  { %p660_p0 = scmp.ne.s32.totalorder %s16_s10, %s659_s11  ;;  %p665_p2 = scmp.lt.s32.totalorder %s659_s11, %s659_s11 }
   0x7   :  { %p666_p3 = por %p665_p2, %p664_p1 }
   0x9   :  { %p667_p4 = pnand %p666_p3, %p660_p0 }
   0xb   :  { %670 = shalt.err (!%p667_p4)
}
   0xc   :  { %s718_s12 = smov 384   ;;  %s719_s13 = smov 24  }
   0xd   :  { %21 = dma.hbm_to_vmem [thread:$0]  %s754_s0, 6144, %s16_s10, [#allocation3], %s718_s12, %s718_s12, %s719_s13  }
   0xe   :  { %s720_s16 = smov [#allocation5]  }
   0xf   :  { %s27_s17 = sshll.u32 %s720_s16, 4  ;;  %s28_s17 = int_to_ptr.vmem [resolvable:$true] %s27_s17 }
  0x10   :  { %s679_s18 = scalar_lea.vmem %s28_s17, 6144  ;;  %p684_p6 = scmp.lt.s32.totalorder %s28_s17, %s28_s17 }
  0x11   :  { %p680_p5 = scmp.ne.s32.totalorder %s28_s17, %s679_s18  ;;  %p685_p7 = scmp.lt.s32.totalorder %s679_s18, %s679_s18 }
  0x13   :  { %p686_p8 = por %p685_p7, %p684_p6 }
  0x15   :  { %p687_p9 = pnand %p686_p8, %p680_p5 }
  0x17   :  { %690 = shalt.err (!%p687_p9)
}
  0x18   :  { %s721_s19 = smov 128   ;;  %s722_s20 = smov 8  }
  0x19   :  { %33 = dma.hbm_to_vmem [thread:$0]  %s755_s1, 6144, %s28_s17, [#allocation6], %s721_s19, %s721_s19, %s722_s20  }
  0x1a   :  { %711 = dma.done.wait [#allocation3], 6144  }
  0x1b   :  { %712 = vsyncadd [#allocation3], 4294961152 }
  0x1c   :  { %713 = dma.done.wait [#allocation6], 6144  }
  0x1d   :  { %714 = vsyncadd [#allocation6], 4294961152  ;;  %v119_v0 = vld [vmem:[#allocation5 + $0xf8] sm:$0xff]  ;;  %v118_v2 = vld [vmem:[#allocation5 + $0xf0] sm:$0xff]  ;;  %s723_s0 = smov [#allocation7]  }
  0x1e   :  { %v103_v1 = vld [vmem:[#allocation5 + $0x78] sm:$0xff]  ;;  %476 = vmatprep.subr.mxu0 %v119_v0  ;;  %v102_v4 = vld [vmem:[#allocation5 + $0x70] sm:$0xff]  ;;  %v117_v5 = vld [vmem:[#allocation5 + $0xe8] sm:$0xff]  ;;  %s463_s1 = sshll.u32 %s723_s0, 4  ;;  %s464_s1 = int_to_ptr.vmem [resolvable:$true] %s463_s1 }
  0x1f   :  { %v135_v3 = vld [vmem:[#allocation5 + $0x178] sm:$0xff]  ;;  %477 = vmatpush3.msra.mxu0 %v103_v1  ;;  %v134_v6 = vld [vmem:[#allocation5 + $0x170] sm:$0xff]  ;;  %v101_v7 = vld [vmem:[#allocation5 + $0x68] sm:$0xff]  ;;  %s691_s23 = scalar_lea.vmem %s464_s1, 2048  ;;  %p696_p11 = scmp.lt.s32.totalorder %s464_s1, %s464_s1 }
  0x20   :  { %588 = vmatprep.subr.mxu1 %v135_v3  ;;  %478 = vmatprep.subr.mxu0 %v118_v2  ;;  %v133_v8 = vld [vmem:[#allocation5 + $0x168] sm:$0xff]  ;;  %v116_v9 = vld [vmem:[#allocation5 + $0xe0] sm:$0xff]  ;;  %v115_v12 = vld [vmem:[#allocation5 + $0xd8] sm:$0xff]  ;;  %p692_p10 = scmp.ne.s32.totalorder %s464_s1, %s691_s23  ;;  %p697_p12 = scmp.lt.s32.totalorder %s691_s23, %s691_s23 }
  0x21   :  { %589 = vmatpush3.msra.mxu1 %v135_v3  ;;  %479 = vmatpush3.msra.mxu0 %v102_v4  ;;  %v100_v10 = vld [vmem:[#allocation5 + $0x60] sm:$0xff]  ;;  %v99_v13 = vld [vmem:[#allocation5 + $0x58] sm:$0xff]  ;;  %v114_v15 = vld [vmem:[#allocation5 + $0xd0] sm:$0xff] }
  0x22   :  { %590 = vmatprep.subr.mxu1 %v134_v6  ;;  %480 = vmatprep.subr.mxu0 %v117_v5  ;;  %v132_v11 = vld [vmem:[#allocation5 + $0x160] sm:$0xff]  ;;  %v131_v14 = vld [vmem:[#allocation5 + $0x158] sm:$0xff]  ;;  %v98_v16 = vld [vmem:[#allocation5 + $0x50] sm:$0xff]  ;;  %p698_p13 = por %p697_p12, %p696_p11 }
  0x23   :  { %591 = vmatpush3.msra.mxu1 %v134_v6  ;;  %481 = vmatpush3.msra.mxu0 %v101_v7  ;;  %v130_v17 = vld [vmem:[#allocation5 + $0x150] sm:$0xff]  ;;  %v113_v18 = vld [vmem:[#allocation5 + $0xc8] sm:$0xff]  ;;  %v112_v21 = vld [vmem:[#allocation5 + $0xc0] sm:$0xff] }
  0x24   :  { %592 = vmatprep.subr.mxu1 %v133_v8  ;;  %482 = vmatprep.subr.mxu0 %v116_v9  ;;  %v97_v19 = vld [vmem:[#allocation5 + $0x48] sm:$0xff]  ;;  %v96_v22 = vld [vmem:[#allocation5 + $0x40] sm:$0xff]  ;;  %v111_v24 = vld [vmem:[#allocation5 + $0xb8] sm:$0xff]  ;;  %p699_p0 = pnand %p698_p13, %p692_p10 }
  0x25   :  { %593 = vmatpush3.msra.mxu1 %v133_v8  ;;  %483 = vmatpush3.msra.mxu0 %v100_v10  ;;  %v129_v20 = vld [vmem:[#allocation5 + $0x148] sm:$0xff]  ;;  %v128_v23 = vld [vmem:[#allocation5 + $0x140] sm:$0xff]  ;;  %v95_v25 = vld [vmem:[#allocation5 + $0x38] sm:$0xff] }
  0x26   :  { %594 = vmatprep.subr.mxu1 %v132_v11  ;;  %484 = vmatprep.subr.mxu0 %v115_v12  ;;  %v127_v26 = vld [vmem:[#allocation5 + $0x138] sm:$0xff]  ;;  %v110_v27 = vld [vmem:[#allocation5 + $0xb0] sm:$0xff]  ;;  %v109_v30 = vld [vmem:[#allocation5 + $0xa8] sm:$0xff] }
  0x27   :  { %595 = vmatpush3.msra.mxu1 %v132_v11  ;;  %485 = vmatpush3.msra.mxu0 %v99_v13  ;;  %v94_v28 = vld [vmem:[#allocation5 + $0x30] sm:$0xff]  ;;  %v93_v31 = vld [vmem:[#allocation5 + $0x28] sm:$0xff]  ;;  %v108_v33 = vld [vmem:[#allocation5 + $0xa0] sm:$0xff] }
  0x28   :  { %596 = vmatprep.subr.mxu1 %v131_v14  ;;  %486 = vmatprep.subr.mxu0 %v114_v15  ;;  %v126_v29 = vld [vmem:[#allocation5 + $0x130] sm:$0xff]  ;;  %v125_v32 = vld [vmem:[#allocation5 + $0x128] sm:$0xff]  ;;  %v92_v34 = vld [vmem:[#allocation5 + $0x20] sm:$0xff] }
  0x29   :  { %597 = vmatpush3.msra.mxu1 %v131_v14  ;;  %487 = vmatpush3.msra.mxu0 %v98_v16  ;;  %v124_v35 = vld [vmem:[#allocation5 + $0x120] sm:$0xff]  ;;  %v107_v36 = vld [vmem:[#allocation5 + $0x98] sm:$0xff]  ;;  %v106_v39 = vld [vmem:[#allocation5 + $0x90] sm:$0xff] }
  0x2a   :  { %598 = vmatprep.subr.mxu1 %v130_v17  ;;  %488 = vmatprep.subr.mxu0 %v113_v18  ;;  %v91_v37 = vld [vmem:[#allocation5 + $0x18] sm:$0xff]  ;;  %v90_v40 = vld [vmem:[#allocation5 + $0x10] sm:$0xff]  ;;  %v105_v42 = vld [vmem:[#allocation5 + $0x88] sm:$0xff] }
  0x2b   :  { %599 = vmatpush3.msra.mxu1 %v130_v17  ;;  %489 = vmatpush3.msra.mxu0 %v97_v19  ;;  %v123_v38 = vld [vmem:[#allocation5 + $0x118] sm:$0xff]  ;;  %v122_v41 = vld [vmem:[#allocation5 + $0x110] sm:$0xff]  ;;  %v89_v43 = vld [vmem:[#allocation5 + $0x8] sm:$0xff] }
  0x2c   :  { %600 = vmatprep.subr.mxu1 %v129_v20  ;;  %490 = vmatprep.subr.mxu0 %v112_v21  ;;  %v121_v44 = vld [vmem:[#allocation5 + $0x108] sm:$0xff]  ;;  %v104_v45 = vld [vmem:[#allocation5 + $0x80] sm:$0xff]  ;;  %v42_v50 = vld [vmem:[#allocation2 + $0x10] sm:$0xff] }
  0x2d   :  { %601 = vmatpush3.msra.mxu1 %v129_v20  ;;  %491 = vmatpush3.msra.mxu0 %v96_v22  ;;  %v41_v46 = vld [vmem:[#allocation2 + $0x8] sm:$0xff]  ;;  %v88_v47 = vld [vmem:[#allocation5] sm:$0xff]  ;;  %v43_v54 = vld [vmem:[#allocation2 + $0x18] sm:$0xff] }
  0x2e   :  { %602 = vmatprep.subr.mxu1 %v128_v23  ;;  %492 = vmatprep.subr.mxu0 %v111_v24  ;;  %v40_v48 = vld [vmem:[#allocation2] sm:$0xff]  ;;  %v45_v51 = vld [vmem:[#allocation2 + $0x28] sm:$0xff]  ;;  %v47_v55 = vld [vmem:[#allocation2 + $0x38] sm:$0xff] }
  0x2f   :  { %603 = vmatpush3.msra.mxu1 %v128_v23  ;;  %493 = vmatpush3.msra.mxu0 %v95_v25  ;;  %v120_v49 = vld [vmem:[#allocation5 + $0x100] sm:$0xff]  ;;  %v51_v56 = vld [vmem:[#allocation2 + $0x58] sm:$0xff]  ;;  %v54_v57 = vld [vmem:[#allocation2 + $0x70] sm:$0xff] }
  0x30   :  { %604 = vmatprep.subr.mxu1 %v127_v26  ;;  %494 = vmatprep.subr.mxu0 %v110_v27  ;;  %v44_v52 = vld [vmem:[#allocation2 + $0x20] sm:$0xff]  ;;  %v46_v58 = vld [vmem:[#allocation2 + $0x30] sm:$0xff]  ;;  %v57_v60 = vld [vmem:[#allocation2 + $0x88] sm:$0xff] }
  0x31   :  { %605 = vmatpush3.msra.mxu1 %v127_v26  ;;  %495 = vmatpush3.msra.mxu0 %v94_v28  ;;  %v48_v53 = vld [vmem:[#allocation2 + $0x40] sm:$0xff]  ;;  %v50_v59 = vld [vmem:[#allocation2 + $0x50] sm:$0xff]  ;;  %v49_v62 = vld [vmem:[#allocation2 + $0x48] sm:$0xff] }
  0x32   :  { %606 = vmatprep.subr.mxu1 %v126_v29  ;;  %496 = vmatprep.subr.mxu0 %v109_v30  ;;  %v60_v61 = vld [vmem:[#allocation2 + $0xa0] sm:$0xff]  ;;  %v53_v63 = vld [vmem:[#allocation2 + $0x68] sm:$0xff]  ;;  %v63_v0 = vld [vmem:[#allocation2 + $0xb8] sm:$0xff] }
  0x33   :  { %607 = vmatpush3.msra.mxu1 %v126_v29  ;;  %497 = vmatpush3.msra.mxu0 %v93_v31  ;;  %v66_v1 = vld [vmem:[#allocation2 + $0xd0] sm:$0xff]  ;;  %v52_v2 = vld [vmem:[#allocation2 + $0x60] sm:$0xff]  ;;  %v69_v4 = vld [vmem:[#allocation2 + $0xe8] sm:$0xff] }
  0x34   :  { %608 = vmatprep.subr.mxu1 %v125_v32  ;;  %498 = vmatprep.subr.mxu0 %v108_v33  ;;  %v56_v3 = vld [vmem:[#allocation2 + $0x80] sm:$0xff]  ;;  %v55_v6 = vld [vmem:[#allocation2 + $0x78] sm:$0xff]  ;;  %v78_v9 = vld [vmem:[#allocation2 + $0x130] sm:$0xff] }
  0x35   :  { %609 = vmatpush3.msra.mxu1 %v125_v32  ;;  %499 = vmatpush3.msra.mxu0 %v92_v34  ;;  %v72_v5 = vld [vmem:[#allocation2 + $0x100] sm:$0xff]  ;;  %v59_v7 = vld [vmem:[#allocation2 + $0x98] sm:$0xff]  ;;  %v58_v10 = vld [vmem:[#allocation2 + $0x90] sm:$0xff] }
  0x36   :  { %610 = vmatprep.subr.mxu1 %v124_v35  ;;  %500 = vmatprep.subr.mxu0 %v107_v36  ;;  %v75_v8 = vld [vmem:[#allocation2 + $0x118] sm:$0xff]  ;;  %v62_v11 = vld [vmem:[#allocation2 + $0xb0] sm:$0xff]  ;;  %v81_v12 = vld [vmem:[#allocation2 + $0x148] sm:$0xff] }
  0x37   :  { %611 = vmatpush3.msra.mxu1 %v124_v35  ;;  %501 = vmatpush3.msra.mxu0 %v91_v37  ;;  %v84_v13 = vld [vmem:[#allocation2 + $0x160] sm:$0xff]  ;;  %v61_v14 = vld [vmem:[#allocation2 + $0xa8] sm:$0xff]  ;;  %v87_v16 = vld [vmem:[#allocation2 + $0x178] sm:$0xff] }
  0x38   :  { %612 = vmatprep.subr.mxu1 %v123_v38  ;;  %502 = vmatprep.subr.mxu0 %v106_v39  ;;  %v65_v15 = vld [vmem:[#allocation2 + $0xc8] sm:$0xff]  ;;  %v64_v17 = vld [vmem:[#allocation2 + $0xc0] sm:$0xff]  ;;  %v67_v19 = vld [vmem:[#allocation2 + $0xd8] sm:$0xff] }
  0x39   :  { %613 = vmatpush3.msra.mxu1 %v123_v38  ;;  %503 = vmatpush3.msra.mxu0 %v90_v40  ;;  %v68_v18 = vld [vmem:[#allocation2 + $0xe0] sm:$0xff]  ;;  %v71_v20 = vld [vmem:[#allocation2 + $0xf8] sm:$0xff]  ;;  %v70_v21 = vld [vmem:[#allocation2 + $0xf0] sm:$0xff] }
  0x3a   :  { %614 = vmatprep.subr.mxu1 %v122_v41  ;;  %504 = vmatprep.subr.mxu0 %v105_v42  ;;  %v74_v22 = vld [vmem:[#allocation2 + $0x110] sm:$0xff]  ;;  %v73_v23 = vld [vmem:[#allocation2 + $0x108] sm:$0xff]  ;;  %v76_v25 = vld [vmem:[#allocation2 + $0x120] sm:$0xff] }
  0x3b   :  { %615 = vmatpush3.msra.mxu1 %v122_v41  ;;  %505 = vmatpush3.msra.mxu0 %v89_v43  ;;  %v77_v24 = vld [vmem:[#allocation2 + $0x128] sm:$0xff]  ;;  %v80_v26 = vld [vmem:[#allocation2 + $0x140] sm:$0xff]  ;;  %v79_v27 = vld [vmem:[#allocation2 + $0x138] sm:$0xff] }
  0x3c   :  { %616 = vmatprep.subr.mxu1 %v121_v44  ;;  %506 = vmatprep.subr.mxu0 %v104_v45  ;;  %v83_v28 = vld [vmem:[#allocation2 + $0x158] sm:$0xff]  ;;  %v82_v29 = vld [vmem:[#allocation2 + $0x150] sm:$0xff]  ;;  %v85_v31 = vld [vmem:[#allocation2 + $0x168] sm:$0xff] }
  0x3d   :  { %200 = vmatprep.mubr.f32.mxu0 %v41_v46  ;;  %507 = vmatpush3.msra.mxu0 %v88_v47  ;;  %v86_v30 = vld [vmem:[#allocation2 + $0x170] sm:$0xff] }
  0x3e   :  { %617 = vmatpush3.msra.mxu1 %v121_v44  ;;  %201 = vmatmul.mubr.f32.vlgmr.msra.gmra.mxu0 %v40_v48 }
  0x3f   :  { %618 = vmatprep.subr.mxu1 %v120_v49  ;;  %620 = vmatprep.mubr.f32.mxu1 %v42_v50 }
  0x40   :  { %619 = vmatpush3.msra.mxu1 %v120_v49  ;;  %205 = vmatprep.mubr.f32.mxu0 %v44_v52 }
  0x41   :  { %621 = vmatmul.mubr.f32.vlgmr.msra.gmra.mxu1 %v45_v51 }
  0x42   :  { %623 = vmatprep.mubr.f32.mxu1 %v48_v53  ;;  %206 = vmatmul.mubr.f32.gmra.mxu0 %v43_v54 }
  0x43   :  { %210 = vmatprep.mubr.f32.mxu0 %v47_v55 }
  0x45   :  { %624 = vmatmul.mubr.f32.gmra.mxu1 %v51_v56 }
  0x46   :  { %626 = vmatprep.mubr.f32.mxu1 %v54_v57  ;;  %211 = vmatmul.mubr.f32.gmra.mxu0 %v46_v58 }
  0x47   :  { %215 = vmatprep.mubr.f32.mxu0 %v50_v59 }
  0x49   :  { %627 = vmatmul.mubr.f32.gmra.mxu1 %v57_v60 }
  0x4a   :  { %629 = vmatprep.mubr.f32.mxu1 %v60_v61  ;;  %216 = vmatmul.mubr.f32.gmra.mxu0 %v49_v62 }
  0x4b   :  { %220 = vmatprep.mubr.f32.mxu0 %v53_v63 }
  0x4d   :  { %630 = vmatmul.mubr.f32.gmra.mxu1 %v63_v0 }
  0x4e   :  { %632 = vmatprep.mubr.f32.mxu1 %v66_v1  ;;  %221 = vmatmul.mubr.f32.gmra.mxu0 %v52_v2 }
  0x4f   :  { %225 = vmatprep.mubr.f32.mxu0 %v56_v3 }
  0x51   :  { %633 = vmatmul.mubr.f32.gmra.mxu1 %v69_v4 }
  0x52   :  { %635 = vmatprep.mubr.f32.mxu1 %v72_v5  ;;  %226 = vmatmul.mubr.f32.gmra.mxu0 %v55_v6 }
  0x53   :  { %230 = vmatprep.mubr.f32.mxu0 %v59_v7 }
  0x55   :  { %636 = vmatmul.mubr.f32.gmra.mxu1 %v75_v8 }
  0x56   :  { %638 = vmatprep.mubr.f32.mxu1 %v78_v9  ;;  %231 = vmatmul.mubr.f32.gmra.mxu0 %v58_v10 }
  0x57   :  { %235 = vmatprep.mubr.f32.mxu0 %v62_v11 }
  0x59   :  { %639 = vmatmul.mubr.f32.gmra.mxu1 %v81_v12 }
  0x5a   :  { %641 = vmatprep.mubr.f32.mxu1 %v84_v13  ;;  %236 = vmatmul.mubr.f32.gmra.mxu0 %v61_v14 }
  0x5b   :  { %240 = vmatprep.mubr.f32.mxu0 %v65_v15 }
  0x5d   :  { %642 = vmatmul.mubr.f32.gmra.mxu1 %v87_v16 }
  0x5e   :  { %241 = vmatmul.mubr.f32.gmra.mxu0 %v64_v17 }
  0x5f   :  { %245 = vmatprep.mubr.f32.mxu0 %v68_v18 }
  0x62   :  { %246 = vmatmul.mubr.f32.gmra.mxu0 %v67_v19 }
  0x63   :  { %250 = vmatprep.mubr.f32.mxu0 %v71_v20 }
  0x66   :  { %251 = vmatmul.mubr.f32.gmra.mxu0 %v70_v21 }
  0x67   :  { %255 = vmatprep.mubr.f32.mxu0 %v74_v22 }
  0x6a   :  { %256 = vmatmul.mubr.f32.gmra.mxu0 %v73_v23 }
  0x6b   :  { %260 = vmatprep.mubr.f32.mxu0 %v77_v24 }
  0x6e   :  { %261 = vmatmul.mubr.f32.gmra.mxu0 %v76_v25 }
  0x6f   :  { %265 = vmatprep.mubr.f32.mxu0 %v80_v26 }
  0x72   :  { %266 = vmatmul.mubr.f32.gmra.mxu0 %v79_v27 }
  0x73   :  { %270 = vmatprep.mubr.f32.mxu0 %v83_v28 }
  0x76   :  { %271 = vmatmul.mubr.f32.gmra.mxu0 %v82_v29 }
  0x77   :  { %275 = vmatprep.mubr.f32.mxu0 %v86_v30 }
  0x7a   :  { %276 = vmatmul.mubr.f32.gmra.mxu0 %v85_v31 }
  0xfe   :  { %v508_v32 = vpop.f32.mrf.mxu0 }
 0x100   :  { %v509_v33 = vpop.f32.mrf.mxu0 }
 0x101   :  { %v622_v34 = vpop.f32.mrf.mxu1  ;;  %v510_v35 = vadd.f32 %v509_v33, %v508_v32 }
 0x102   :  { %v511_v36 = vpop.f32.mrf.mxu0 }
 0x103   :  { %v347_v37 = vpop.f32.mrf.mxu1 }
 0x104   :  { %v348_v38 = vadd.f32 %v510_v35, %v347_v37  ;;  %v512_v39 = vpop.f32.mrf.mxu0 }
 0x105   :  { %v625_v40 = vpop.f32.mrf.mxu1  ;;  %v513_v42 = vadd.f32 %v512_v39, %v511_v36 }
 0x106   :  { %v426_v41 = vmax.f32 %v348_v38, 0.0  ;;  %v514_v43 = vpop.f32.mrf.mxu0 }
 0x107   :  { %v353_v44 = vadd.f32 %v622_v34, %v513_v42  ;;  %v357_v46 = vpop.f32.mrf.mxu1 }
 0x108   :  { %442 = vst [vmem:[#allocation7] sm:$0xff] %v426_v41  ;;  %v515_v45 = vpop.f32.mrf.mxu0 }
 0x109   :  { %v427_v47 = vmax.f32 %v353_v44, 0.0  ;;  %v516_v48 = vadd.f32 %v515_v45, %v514_v43  ;;  %v628_v52 = vpop.f32.mrf.mxu1 }
 0x10a   :  { %v517_v49 = vpop.f32.mrf.mxu0 }
 0x10b   :  { %443 = vst [vmem:[#allocation7 + $0x8] sm:$0xff] %v427_v47  ;;  %v358_v50 = vadd.f32 %v516_v48, %v357_v46  ;;  %v367_v58 = vpop.f32.mrf.mxu1 }
 0x10c   :  { %v518_v51 = vpop.f32.mrf.mxu0 }
 0x10d   :  { %v428_v53 = vmax.f32 %v358_v50, 0.0  ;;  %v519_v54 = vadd.f32 %v518_v51, %v517_v49  ;;  %v631_v0 = vpop.f32.mrf.mxu1 }
 0x10e   :  { %v520_v55 = vpop.f32.mrf.mxu0 }
 0x10f   :  { %444 = vst [vmem:[#allocation7 + $0x10] sm:$0xff] %v428_v53  ;;  %v363_v56 = vadd.f32 %v625_v40, %v519_v54  ;;  %v377_v6 = vpop.f32.mrf.mxu1 }
 0x110   :  { %v521_v57 = vpop.f32.mrf.mxu0 }
 0x111   :  { %v429_v59 = vmax.f32 %v363_v56, 0.0  ;;  %v522_v60 = vadd.f32 %v521_v57, %v520_v55  ;;  %v634_v12 = vpop.f32.mrf.mxu1 }
 0x112   :  { %v523_v61 = vpop.f32.mrf.mxu0 }
 0x113   :  { %445 = vst [vmem:[#allocation7 + $0x18] sm:$0xff] %v429_v59  ;;  %v368_v62 = vadd.f32 %v522_v60, %v367_v58  ;;  %v387_v18 = vpop.f32.mrf.mxu1 }
 0x114   :  { %v524_v63 = vpop.f32.mrf.mxu0 }
 0x115   :  { %v430_v1 = vmax.f32 %v368_v62, 0.0  ;;  %v525_v2 = vadd.f32 %v524_v63, %v523_v61  ;;  %v637_v24 = vpop.f32.mrf.mxu1 }
 0x116   :  { %v526_v3 = vpop.f32.mrf.mxu0 }
 0x117   :  { %446 = vst [vmem:[#allocation7 + $0x20] sm:$0xff] %v430_v1  ;;  %v373_v4 = vadd.f32 %v628_v52, %v525_v2  ;;  %v397_v30 = vpop.f32.mrf.mxu1 }
 0x118   :  { %v527_v5 = vpop.f32.mrf.mxu0 }
 0x119   :  { %v431_v7 = vmax.f32 %v373_v4, 0.0  ;;  %v528_v8 = vadd.f32 %v527_v5, %v526_v3  ;;  %v640_v36 = vpop.f32.mrf.mxu1 }
 0x11a   :  { %v529_v9 = vpop.f32.mrf.mxu0 }
 0x11b   :  { %447 = vst [vmem:[#allocation7 + $0x28] sm:$0xff] %v431_v7  ;;  %v378_v10 = vadd.f32 %v528_v8, %v377_v6  ;;  %v407_v42 = vpop.f32.mrf.mxu1 }
 0x11c   :  { %v530_v11 = vpop.f32.mrf.mxu0 }
 0x11d   :  { %v432_v13 = vmax.f32 %v378_v10, 0.0  ;;  %v531_v14 = vadd.f32 %v530_v11, %v529_v9  ;;  %v643_v48 = vpop.f32.mrf.mxu1 }
 0x11e   :  { %v532_v15 = vpop.f32.mrf.mxu0 }
 0x11f   :  { %448 = vst [vmem:[#allocation7 + $0x30] sm:$0xff] %v432_v13  ;;  %v383_v16 = vadd.f32 %v631_v0, %v531_v14  ;;  %v417_v54 = vpop.f32.mrf.mxu1 }
 0x120   :  { %v533_v17 = vpop.f32.mrf.mxu0 }
 0x121   :  { %v433_v19 = vmax.f32 %v383_v16, 0.0  ;;  %v534_v20 = vadd.f32 %v533_v17, %v532_v15 }
 0x122   :  { %v535_v21 = vpop.f32.mrf.mxu0 }
 0x123   :  { %449 = vst [vmem:[#allocation7 + $0x38] sm:$0xff] %v433_v19  ;;  %v388_v22 = vadd.f32 %v534_v20, %v387_v18 }
 0x124   :  { %v536_v23 = vpop.f32.mrf.mxu0 }
 0x125   :  { %v434_v25 = vmax.f32 %v388_v22, 0.0  ;;  %v537_v26 = vadd.f32 %v536_v23, %v535_v21 }
 0x126   :  { %v538_v27 = vpop.f32.mrf.mxu0 }
 0x127   :  { %450 = vst [vmem:[#allocation7 + $0x40] sm:$0xff] %v434_v25  ;;  %v393_v28 = vadd.f32 %v634_v12, %v537_v26 }
 0x128   :  { %v539_v29 = vpop.f32.mrf.mxu0 }
 0x129   :  { %v435_v31 = vmax.f32 %v393_v28, 0.0  ;;  %v540_v32 = vadd.f32 %v539_v29, %v538_v27 }
 0x12a   :  { %v541_v33 = vpop.f32.mrf.mxu0 }
 0x12b   :  { %451 = vst [vmem:[#allocation7 + $0x48] sm:$0xff] %v435_v31  ;;  %v398_v34 = vadd.f32 %v540_v32, %v397_v30 }
 0x12c   :  { %v542_v35 = vpop.f32.mrf.mxu0 }
 0x12d   :  { %v436_v37 = vmax.f32 %v398_v34, 0.0  ;;  %v543_v38 = vadd.f32 %v542_v35, %v541_v33 }
 0x12e   :  { %v544_v39 = vpop.f32.mrf.mxu0 }
 0x12f   :  { %452 = vst [vmem:[#allocation7 + $0x50] sm:$0xff] %v436_v37  ;;  %v403_v40 = vadd.f32 %v637_v24, %v543_v38 }
 0x130   :  { %v545_v41 = vpop.f32.mrf.mxu0 }
 0x131   :  { %v437_v43 = vmax.f32 %v403_v40, 0.0  ;;  %v546_v44 = vadd.f32 %v545_v41, %v544_v39 }
 0x132   :  { %v547_v45 = vpop.f32.mrf.mxu0 }
 0x133   :  { %453 = vst [vmem:[#allocation7 + $0x58] sm:$0xff] %v437_v43  ;;  %v408_v46 = vadd.f32 %v546_v44, %v407_v42 }
 0x134   :  { %v548_v47 = vpop.f32.mrf.mxu0 }
 0x135   :  { %v438_v49 = vmax.f32 %v408_v46, 0.0  ;;  %v549_v50 = vadd.f32 %v548_v47, %v547_v45 }
 0x136   :  { %v550_v51 = vpop.f32.mrf.mxu0 }
 0x137   :  { %454 = vst [vmem:[#allocation7 + $0x60] sm:$0xff] %v438_v49  ;;  %v413_v52 = vadd.f32 %v640_v36, %v549_v50 }
 0x138   :  { %v551_v53 = vpop.f32.mrf.mxu0 }
 0x139   :  { %v439_v55 = vmax.f32 %v413_v52, 0.0  ;;  %v552_v56 = vadd.f32 %v551_v53, %v550_v51 }
 0x13a   :  { %v553_v57 = vpop.f32.mrf.mxu0 }
 0x13b   :  { %455 = vst [vmem:[#allocation7 + $0x68] sm:$0xff] %v439_v55  ;;  %v418_v58 = vadd.f32 %v552_v56, %v417_v54 }
 0x13c   :  { %v554_v59 = vpop.f32.mrf.mxu0 }
 0x13d   :  { %v440_v60 = vmax.f32 %v418_v58, 0.0  ;;  %v555_v61 = vadd.f32 %v554_v59, %v553_v57 }
 0x13f   :  { %456 = vst [vmem:[#allocation7 + $0x70] sm:$0xff] %v440_v60  ;;  %v423_v62 = vadd.f32 %v643_v48, %v555_v61 }
 0x141   :  { %v441_v63 = vmax.f32 %v423_v62, 0.0 }
 0x143   :  { %457 = vst [vmem:[#allocation7 + $0x78] sm:$0xff] %v441_v63 }
 0x144   :  { %702 = shalt.err (!%p699_p0)
}
 0x145   :  { %469 = dma.vmem_to_hbm [thread:$0]  %s464_s1, 2048, %s756_s2, [#allocation4], %s721_s19, %s721_s19, %s722_s20  }
 0x146   :  { %715 = dma.done.wait [#allocation4], 2048  }
 0x147   :  { %716 = vsyncadd [#allocation4], 4294965248 }
 0x148   :  { %473 = vsyncpa [#allocation3], 1 }
 0x149   :  { %474 = vsyncpa [#allocation6], 1 }
 0x14a   :  { %475 = vsyncpa [#allocation4], 1 }

</bundles_post_ra>
